<compile_context>
chip_gen: v5e
topology: v5e:2x2
jax: 0.10.0
libtpu: 0.0.40
codegen_flags: <defaults>
</compile_context>

<pallas_src>
import functools
import math

import jax
import jax.numpy as jnp
from jax.experimental import pallas as pl
from jax.experimental.pallas import tpu as pltpu


def _sine_kernel(x_ref, w_ref, b_ref, o_ref, *, unroll_channels):
    # x_ref: (C_in, TL)   activation slab, length in lanes
    # w_ref: (C_out, C_in) omega-scaled weight (resident across the grid)
    # b_ref: (C_out, 1)    omega-scaled bias
    # o_ref: (C_out, TL)   lane-dense output tile
    x = x_ref[...]
    w = w_ref[...]
    b = b_ref[...]
    c_out, tl = o_ref.shape
    if unroll_channels:
        # Tiny C_in: MXU would run at <1% utilization; do C_in broadcast
        # multiply-adds on the VPU over the (C_out, TL) tile instead.
        acc = jnp.broadcast_to(b, (c_out, tl)).astype(jnp.float32)
        for c in range(x.shape[0]):
            acc = acc + w[:, c:c + 1] * x[c:c + 1, :]
    else:
        acc = jnp.dot(w, x, preferred_element_type=jnp.float32) + b
    o_ref[...] = jnp.sin(acc).astype(o_ref.dtype)


def _choose_length_tiling(length):
    """Returns (tile, padded_length); prefers lane-dense multiple-of-128 tiles."""
    if length % 128 == 0:
        l_pad = length
    elif length < 128:
        # Toy sizes: a single full-L block satisfies the tiling rule.
        return length, length
    else:
        l_pad = ((length + 127) // 128) * 128
    for t in (2048, 1024, 512, 256, 128):
        if l_pad % t == 0:
            return t, l_pad
    return l_pad, l_pad


def sine_layer_forward(x_ncl, weight, bias, omega_0=30.0):
    """x_ncl: (N, C_in, L) float32.  weight: (C_out, C_in).  bias: (C_out,)."""
    n, c_in, length = x_ncl.shape
    c_out = weight.shape[0]

    # Fold omega_0 into the (tiny) weight/bias so the kernel hot loop only
    # does MAC + sin.  This touches (C_out, C_in) + (C_out,) only, never the
    # big activation tensor.
    w_s = (omega_0 * weight).astype(jnp.float32)
    b_s = (omega_0 * bias).astype(jnp.float32).reshape(c_out, 1)

    tl, l_pad = _choose_length_tiling(length)
    if l_pad != length:
        x_ncl = jnp.pad(x_ncl, ((0, 0), (0, 0), (0, l_pad - length)))
    n_l_tiles = l_pad // tl

    unroll_channels = c_in <= 16
    kernel = functools.partial(_sine_kernel, unroll_channels=unroll_channels)

    out = pl.pallas_call(
        kernel,
        out_shape=jax.ShapeDtypeStruct((n, c_out, l_pad), x_ncl.dtype),
        grid_spec=pltpu.PrefetchScalarGridSpec(
            num_scalar_prefetch=0,
            grid=(n, n_l_tiles),
            in_specs=[
                # Activation tile: batch dim squeezed, L tiled along lanes.
                pl.BlockSpec((None, c_in, tl), lambda b, l: (b, 0, l)),
                # Weight / bias: single resident block across the whole grid.
                pl.BlockSpec((c_out, c_in), lambda b, l: (0, 0)),
                pl.BlockSpec((c_out, 1), lambda b, l: (0, 0)),
            ],
            out_specs=pl.BlockSpec((None, c_out, tl), lambda b, l: (b, 0, l)),
        ),
        compiler_params=pltpu.CompilerParams(
            # Independent tiles on both axes -> shardable across TensorCores.
            dimension_semantics=("parallel", "parallel"),
            # Explicit scoped-VMEM budget with headroom; fits v5e/v6e/v7x.
            vmem_limit_bytes=48 * 1024 * 1024,
        ),
    )(x_ncl, w_s, b_s)

    if l_pad != length:
        out = out[:, :, :length]
    return out


def init_sine_layer_params(key, in_features, out_features, is_first=False,
                           omega_0=30.0):
    """Deterministic init matching SineLayer.init_weights (synthetic)."""
    kw, kb = jax.random.split(key)
    if is_first:
        bound_w = 1.0 / in_features
    else:
        bound_w = math.sqrt(6.0 / in_features) / omega_0
    weight = jax.random.uniform(
        kw, (out_features, in_features), jnp.float32, -bound_w, bound_w)
    # Conv1d default bias init: U(-1/sqrt(fan_in), 1/sqrt(fan_in)).
    bound_b = 1.0 / math.sqrt(in_features)
    bias = jax.random.uniform(
        kb, (out_features,), jnp.float32, -bound_b, bound_b)
    return weight, bias


if __name__ == "__main__":
    key = jax.random.PRNGKey(0)
    k_x, k_p = jax.random.split(key)

    batch, in_features, out_features, length = 2, 4, 8, 16
    omega_0 = 30.0
    is_first = True

    x = jax.random.normal(k_x, (batch, in_features, length), jnp.float32)
    weight, bias = init_sine_layer_params(
        k_p, in_features, out_features, is_first=is_first, omega_0=omega_0)

    y = sine_layer_forward(x, weight, bias, omega_0=omega_0)
    y = jax.block_until_ready(y)

    # Cross-check against a pure-JAX reference of the same math (un-folded).
    ref = jnp.sin(
        omega_0 * (jnp.einsum("ncl,oc->nol", x, weight,
                              precision=jax.lax.Precision.HIGHEST)
                   + bias[None, :, None]))
    assert y.shape == (batch, out_features, length)
    assert jnp.allclose(y, ref, atol=1e-4, rtol=1e-4)

    print("KERNEL_OK")
</pallas_src>

<mosaic_0001>
module attributes {stable_mosaic.version = 11 : i64} {
  func.func @_sine_kernel(%arg0: i32, %arg1: i32, %arg2: memref<1x4x16xf32, #tpu.memory_space<vmem>>, %arg3: memref<8x4xf32, #tpu.memory_space<vmem>>, %arg4: memref<8x1xf32, #tpu.memory_space<vmem>>, %arg5: memref<1x8x16xf32, #tpu.memory_space<vmem>>) attributes {dimension_semantics = [#tpu.dimension_semantics<parallel>, #tpu.dimension_semantics<parallel>], iteration_bounds = array<i64: 2, 1>, scalar_prefetch = 0 : i64, scratch_operands = 0 : i64, tpu.core_type = #tpu.core_type<tc>, window_params = [{transform_indices = @transform_0, window_bounds = array<i64: 1, 4, 16>}, {pipeline_mode = #tpu.pipeline_mode<synchronous>, transform_indices = @transform_1, window_bounds = array<i64: 8, 4>}, {pipeline_mode = #tpu.pipeline_mode<synchronous>, transform_indices = @transform_2, window_bounds = array<i64: 8, 1>}, {transform_indices = @transform_3, window_bounds = array<i64: 1, 8, 16>}]} {
    %c0 = arith.constant 0 : index
    %c0_0 = arith.constant 0 : index
    %c0_1 = arith.constant 0 : index
    %0 = vector.load %arg2[%c0, %c0_0, %c0_1] : memref<1x4x16xf32, #tpu.memory_space<vmem>>, vector<1x4x16xf32>
    %1 = vector.shape_cast %0 : vector<1x4x16xf32> to vector<4x16xf32>
    %c0_2 = arith.constant 0 : index
    %c0_3 = arith.constant 0 : index
    %2 = vector.load %arg3[%c0_2, %c0_3] : memref<8x4xf32, #tpu.memory_space<vmem>>, vector<8x4xf32>
    %c0_4 = arith.constant 0 : index
    %c0_5 = arith.constant 0 : index
    %3 = vector.load %arg4[%c0_4, %c0_5] : memref<8x1xf32, #tpu.memory_space<vmem>>, vector<8x1xf32>
    %4 = vector.shape_cast %3 : vector<8x1xf32> to vector<8x1xf32>
    %5 = vector.broadcast %4 : vector<8x1xf32> to vector<8x16xf32>
    %6 = vector.extract_strided_slice %2 {offsets = [0, 0], sizes = [8, 1], strides = [1, 1]} : vector<8x4xf32> to vector<8x1xf32>
    %7 = vector.extract_strided_slice %1 {offsets = [0, 0], sizes = [1, 16], strides = [1, 1]} : vector<4x16xf32> to vector<1x16xf32>
    %8 = vector.broadcast %6 : vector<8x1xf32> to vector<8x16xf32>
    %9 = vector.broadcast %7 : vector<1x16xf32> to vector<8x16xf32>
    %10 = arith.mulf %8, %9 : vector<8x16xf32>
    %11 = arith.addf %5, %10 : vector<8x16xf32>
    %12 = vector.extract_strided_slice %2 {offsets = [0, 1], sizes = [8, 1], strides = [1, 1]} : vector<8x4xf32> to vector<8x1xf32>
    %13 = vector.extract_strided_slice %1 {offsets = [1, 0], sizes = [1, 16], strides = [1, 1]} : vector<4x16xf32> to vector<1x16xf32>
    %14 = vector.broadcast %12 : vector<8x1xf32> to vector<8x16xf32>
    %15 = vector.broadcast %13 : vector<1x16xf32> to vector<8x16xf32>
    %16 = arith.mulf %14, %15 : vector<8x16xf32>
    %17 = arith.addf %11, %16 : vector<8x16xf32>
    %18 = vector.extract_strided_slice %2 {offsets = [0, 2], sizes = [8, 1], strides = [1, 1]} : vector<8x4xf32> to vector<8x1xf32>
    %19 = vector.extract_strided_slice %1 {offsets = [2, 0], sizes = [1, 16], strides = [1, 1]} : vector<4x16xf32> to vector<1x16xf32>
    %20 = vector.broadcast %18 : vector<8x1xf32> to vector<8x16xf32>
    %21 = vector.broadcast %19 : vector<1x16xf32> to vector<8x16xf32>
    %22 = arith.mulf %20, %21 : vector<8x16xf32>
    %23 = arith.addf %17, %22 : vector<8x16xf32>
    %24 = vector.extract_strided_slice %2 {offsets = [0, 3], sizes = [8, 1], strides = [1, 1]} : vector<8x4xf32> to vector<8x1xf32>
    %25 = vector.extract_strided_slice %1 {offsets = [3, 0], sizes = [1, 16], strides = [1, 1]} : vector<4x16xf32> to vector<1x16xf32>
    %26 = vector.broadcast %24 : vector<8x1xf32> to vector<8x16xf32>
    %27 = vector.broadcast %25 : vector<1x16xf32> to vector<8x16xf32>
    %28 = arith.mulf %26, %27 : vector<8x16xf32>
    %29 = arith.addf %23, %28 : vector<8x16xf32>
    %30 = math.sin %29 : vector<8x16xf32>
    %c0_6 = arith.constant 0 : index
    %c0_7 = arith.constant 0 : index
    %c0_8 = arith.constant 0 : index
    %31 = vector.load %arg5[%c0_6, %c0_7, %c0_8] : memref<1x8x16xf32, #tpu.memory_space<vmem>>, vector<1x8x16xf32>
    %32 = vector.shape_cast %31 : vector<1x8x16xf32> to vector<8x16xf32>
    %33 = vector.shape_cast %30 : vector<8x16xf32> to vector<1x8x16xf32>
    tpu.vector_store %arg5[%c0_6, %c0_7, %c0_8], %33 {strides = array<i32>} : memref<1x8x16xf32, #tpu.memory_space<vmem>>, vector<1x8x16xf32>,
    return
  }
  func.func @transform_0(%arg0: i32, %arg1: i32) -> (i32, i32, i32) {
    %c0_i32 = arith.constant 0 : i32
    %c0_i32_0 = arith.constant 0 : i32
    return %arg0, %c0_i32, %arg1 : i32, i32, i32
  }
  func.func @transform_1(%arg0: i32, %arg1: i32) -> (i32, i32) {
    %c0_i32 = arith.constant 0 : i32
    %c0_i32_0 = arith.constant 0 : i32
    %c0_i32_1 = arith.constant 0 : i32
    return %c0_i32, %c0_i32_0 : i32, i32
  }
  func.func @transform_2(%arg0: i32, %arg1: i32) -> (i32, i32) {
    %c0_i32 = arith.constant 0 : i32
    %c0_i32_0 = arith.constant 0 : i32
    %c0_i32_1 = arith.constant 0 : i32
    return %c0_i32, %c0_i32_0 : i32, i32
  }
  func.func @transform_3(%arg0: i32, %arg1: i32) -> (i32, i32, i32) {
    %c0_i32 = arith.constant 0 : i32
    %c0_i32_0 = arith.constant 0 : i32
    return %arg0, %c0_i32, %arg1 : i32, i32, i32
  }
}

</mosaic_0001>

<bundles_post_ra>
// kernel: tpu_custom_call.1
= control target key start
LH: loop header
LB: loop body
LE: loop exit
PB: predicated region body
PF: predicated region fallthrough
CT: control target
= control target key end

     0   :  { %8 = vsyncpa [#allocation3], 0  ;;  %s846_s0 = inlined_call_operand.vmem [shape: f32[2,4,16], index: 0, kind: input, shape index: {}]   ;;  %s847_s1 = inlined_call_operand.vmem [shape: f32[8,4], index: 1, kind: input, shape index: {}]   ;;  %s848_s2 = inlined_call_operand.vmem [shape: f32[8,1], index: 2, kind: input, shape index: {}]   ;;  %s849_s3 = inlined_call_operand.hbm [shape: f32[2,8,16], index: 3, kind: output, shape index: {}]  }
   0x1   :  { %10 = vsyncpa [#allocation3 + $0x1], 0  ;;  %s667_s12 = smov 0   ;;  %s669_s13 = smov 0  }
   0x2   :  { %s671_s14 = smov 0   ;;  %s673_s15 = smov 0  }
   0x3   :  { %s675_s16 = smov 0   ;;  %s677_s17 = smov 0  }
   0x4 LB: > { %s473_s18 = sadd.s32 4294967295, %s635_s17   ;;  %s474_s19 = sadd.s32 4294967294, %s635_s17   ;;  %s635_s17 = sphi %s677_s17, %s16_s17   ;;  %s631_s16 = sphi %s675_s16, %s858_s16   ;;  %s627_s15 = sphi %s673_s15, %s857_s15   ;;  %s623_s14 = sphi %s671_s14, %s856_s14   ;;  %s619_s13 = sphi %s669_s13, %s855_s13   ;;  %s615_s12 = sphi %s667_s12, %s854_s12  }
   0x5   : > { %s28_s20 = sadd.s32 1, %s631_s16  ;;  %s107_s21 = sadd.s32 1, %s623_s14 }
   0x6   : > { %p30_p0 = scmp.ge.s32.totalorder %s28_s20, 2  ;;  %p117_p1 = scmp.ne.s32.totalorder %s623_s14, %s619_s13 }
   0x7   : > { %p118_p2 = scmp.eq.s32.totalorder %s473_s18, 1  ;;  %p123_p3 = scmp.ne.s32.totalorder %s619_s13, %s615_s12 }
   0x8   : > { %s860_s20 = smov (%p30_p0, %s28_s20), 0  ;;  %p124_p5 = scmp.eq.s32.totalorder %s474_s19, 1 }
   0x9   : > { %p707_p4 = por %p118_p2, %p117_p1  ;;  %s102_s23 = ssub.s32 %s631_s16, %s860_s20 }
   0xa   : > { %p477_p6 = scmp.ge.s32.totalorder %s635_s17, 1  ;;  %p105_p7 = scmp.eq.s32.totalorder %s102_s23, 0 }
   0xb   : > { %p714_p8 = por %p124_p5, %p123_p3  ;;  %p158_p9 = scmp.lt.s32.totalorder %s635_s17, 3 }
   0xc   : > { %s720_s25 = scalar_select %p105_p7, %s623_s14, %s107_s21  }
   0xd   : > { %p159_p10 = pnand %p477_p6, %p158_p9 }
   0xe   : > { %p184_p11 = scmp.lt.s32.totalorder (!%p159_p10), %s627_s15, 1  ;;  %s181_s8 = sand.u32 (!%p159_p10), 1, %s619_s13  }
   0xf   : > { %162 = sbr.rel (%p159_p10) target bundleno = 252 (0xfc), region = 32  ;;  %s478_s9 = sshll.u32 (!%p159_p10), %s181_s8, 3 }
  0x10   : > { %s484_s10 = sshll.u32 (!%p159_p10), %s627_s15, 3  ;;  %s183_s21 = scalar_lea.vmem (!%p159_p10), [#allocation2], %s478_s9 }
  0x11   : > { %s397_s19 = scalar_lea.hbm (!%p159_p10), %s849_s3, %s484_s10  ;;  %s808_s23 = sshll.u32 (!%p159_p10), %s183_s21, 4  ;;  %s400_s23 = int_to_ptr.vmem [resolvable:$true] %s808_s23 }
  0x12   : > { %s401_s26 = sshll.u32 (!%p159_p10), %s397_s19, 4  ;;  %s402_s26 = int_to_ptr.hbm [resolvable:$true] %s401_s26 }
  0x13   : > { %s571_s27 = sshra.s32 (!%p159_p10), %s402_s26, 4  ;;  %s572_s27 = int_to_ptr.hbm [resolvable:$true] %s571_s27 }
  0x14   : > { %v192_v0 = vld [vmem:[%s847_s1] sm:$0xff]  ;;  %v637_v1 = vmov 0   ;;  %v638_v2 = vmov 1   ;;  %v639_v3 = vmov 3   ;;  %v640_v5 = vmov 2   ;;  %s185_s30 = scalar_select %p184_p11, %s627_s15, 1 }
  0x15   : > { %552 = vset.pattern.permute.xlu0 %v637_v1  ;;  %553 = vset.pattern.permute.xlu1 %v638_v2  ;;  %v193_v4 = vld [vmem:[%s848_s2] sm:$0xff]  ;;  %v641_v35 = vmov 683565275   ;;  %v642_v37 = vmov 2475754826   ;;  %s386_s15 = scalar_lea.sflag [#allocation3], %s181_s8  ;;  %p578_p1 = scmp.lt.s32.totalorder %s572_s27, %s849_s3 }
  0x16   : > { %201 = vperm.xlu0 %552, %v192_v0   ;;  %208 = vperm.xlu1 %553, %v192_v0   ;;  %s479_s4 = sshll.u32 %s185_s30, 2  ;;  %v643_v40 = vmov 2131351028   ;;  %v644_v43 = vmov 2102212464   ;;  %s573_s28 = scalar_lea.hbm %s572_s27, 8 }
  0x17   : > { %555 = vset.pattern.permute.xlu2 %v639_v3  ;;  %s190_s7 = scalar_lea.vmem %s846_s0, %s479_s4  ;;  %v645_v46 = vmov 920167782   ;;  %v646_v49 = vmov 1326507024   ;;  %p574_p12 = scmp.ne.s32.totalorder %s572_s27, %s573_s28 }
  0x18   : > { %222 = vperm.xlu2 %555, %v192_v0   ;;  %v191_v7 = vld [vmem:[%s190_s7] sm:$0xf]  ;;  %s577_s4 = scalar_lea.hbm %s849_s3, 16 }
  0x19   : > { %v204_v9 = vperm.slane %v191_v7, 0  ;;  %v211_v10 = vperm.slane %v191_v7, 1  ;;  %v218_v11 = vperm.slane %v191_v7, 2  ;;  %v225_v13 = vperm.slane %v191_v7, 3  ;;  %p575_p13 = pnand %p574_p12, %p707_p4  ;;  %p579_p2 = scmp.lt.s32.totalorder %s577_s4, %s573_s28 }
  0x1b   : > { %p576_p0 = pneg %p575_p13  ;;  %p580_p3 = por %p579_p2, %p578_p1 }
  0x1d   : > { %p581_p5 = pnand %p580_p3, %p576_p0 }
  0x1e   : > { %196 = vperm.xlu0 %552, %v193_v4   ;;  %554 = vset.pattern.permute.xlu1 %v640_v5 }
  0x1f   : > { %215 = vperm.xlu1 %554, %v192_v0  }
  0x26   : > { %556 = vset.pattern.permute.xlu0 %v639_v3 }
  0x72   : > { %v223_v15 = vpop.permute.xlu2 %222 }
  0x73   : > { %v226_v21 = vmul.f32 %v225_v13, %v223_v15 }
  0x88   : > { %v202_v6 = vpop.permute.xlu0 %201  ;;  %v209_v8 = vpop.permute.xlu1 %208 }
  0x89   : > { %v205_v12 = vmul.f32 %v204_v9, %v202_v6  ;;  %v212_v16 = vmul.f32 %v211_v10, %v209_v8 }
  0x90   : > { %v197_v14 = vpop.permute.xlu0 %196 }
  0x91   : > { %v206_v17 = vadd.f32 %v205_v12, %v197_v14  ;;  %v216_v18 = vpop.permute.xlu1 %215 }
  0x92   : > { %v219_v19 = vmul.f32 %v218_v11, %v216_v18 }
  0x93   : > { %v213_v20 = vadd.f32 %v212_v16, %v206_v17 }
  0x95   : > { %v220_v22 = vadd.f32 %v219_v19, %v213_v20 }
  0x97   : > { %v734_v23 = vadd.f32 %v226_v21, %v220_v22 }
  0x99   : > { %v231_v24 = vand.u32 2139095040, %v734_v23  ;;  %v228_v27 = vand.u32 2147483647, %v734_v23  ;;  %vm230_vm12 = vcmp.lt.s32.totalorder %v734_v23, 0 }
  0x9b   : > { %v232_v25 = vshrl.u32 %v231_v24, 23  ;;  %v235_v29 = vand.u32 8388607, %v228_v27  ;;  %vm792_vm13 = vcmp.le.f32.partialorder %v228_v27, 0.7853982 }
  0x9d   : > { %v480_v26 = vadd.s32 4294967169, %v232_v25  ;;  %v236_v33 = vor.u32 8388608, %v235_v29 }
  0x9f   : > { %v238_v28 = vadd.s32 1, %v480_v26  ;;  %v751_v56 = vshll.u32 %v236_v33, 8 }
  0xa1   : > { %vm239_vm0 = vcmp.gt.s32.totalorder %v238_v28, 0  ;;  %v277_v2 = vand.u32 65535, %v751_v56  ;;  %v278_v3 = vshrl.u32 %v751_v56, 16 }
  0xa2   : > { %v240_v30 = vsel %vm239_vm0, %v238_v28, 0 }
  0xa3   : > { %v242_v31 = vand.u32 31, %v240_v30  ;;  %v742_v34 = vshrl.u32 %v240_v30, 5 }
  0xa5   : > { %v740_v32 = vsub.s32 32, %v242_v31  ;;  %v245_v36 = vshll.u32 %v641_v35, %v242_v31  ;;  %v248_v38 = vshll.u32 %v642_v37, %v242_v31  ;;  %v251_v42 = vshll.u32 %v643_v40, %v242_v31 }
  0xa6   : > { %v254_v45 = vshll.u32 %v644_v43, %v242_v31  ;;  %v257_v48 = vshll.u32 %v645_v46, %v242_v31  ;;  %vm260_vm1 = vcmp.lt.s32.totalorder %v742_v34, 1  ;;  %vm263_vm2 = vcmp.lt.s32.totalorder %v742_v34, 4 }
  0xa7   : > { %v246_v39 = vshrl.u32 %v642_v37, %v740_v32  ;;  %v249_v41 = vshrl.u32 %v643_v40, %v740_v32  ;;  %v252_v44 = vshrl.u32 %v644_v43, %v740_v32  ;;  %v255_v47 = vshrl.u32 %v645_v46, %v740_v32 }
  0xa8   : > { %v258_v50 = vshrl.u32 %v646_v49, %v740_v32  ;;  %vm262_vm3 = vcmp.lt.s32.totalorder %v742_v34, 3  ;;  %vm261_vm4 = vcmp.lt.s32.totalorder %v742_v34, 2  ;;  %v244_v30 = vshrl.u32 %v641_v35, %v740_v32 }
  0xa9   : > { %v247_v51 = vor.u32 %v246_v39, %v245_v36  ;;  %v250_v52 = vor.u32 %v249_v41, %v248_v38  ;;  %v253_v53 = vor.u32 %v252_v44, %v251_v42  ;;  %v256_v54 = vor.u32 %v255_v47, %v254_v45 }
  0xaa   : > { %v259_v55 = vor.u32 %v258_v50, %v257_v48 }
  0xab   : > { %v268_v57 = vsel %vm260_vm1, %v247_v51, %v250_v52  ;;  %v272_v58 = vsel %vm260_vm1, %v250_v52, %v253_v53  ;;  %v269_v59 = vsel %vm263_vm2, %v256_v54, 920167782  ;;  %v265_v26 = vsel %vm263_vm2, %v253_v53, 2102212464 }
  0xac   : > { %v273_v60 = vsel %vm263_vm2, %v259_v55, 1326507024  ;;  %v270_v61 = vsel %vm262_vm3, %v253_v53, %v269_v59  ;;  %v264_v39 = vsel %vm260_vm1, %v244_v30, %v247_v51  ;;  %v266_v40 = vsel %vm262_vm3, %v250_v52, %v265_v26 }
  0xad   : > { %v274_v62 = vsel %vm262_vm3, %v256_v54, %v273_v60  ;;  %v271_v63 = vsel %vm261_vm4, %v268_v57, %v270_v61  ;;  %v267_v32 = vsel %vm261_vm4, %v264_v39, %v266_v40  ;;  %vm383_vm1 = vcmask 130048  }
  0xae   : > { %v275_v0 = vsel %vm261_vm4, %v272_v58, %v274_v62  ;;  %v301_v6 = vand.u32 65535, %v271_v63  ;;  %v302_v7 = vshrl.u32 %v271_v63, 16  ;;  %v321_v47 = vmul.u32 %v751_v56, %v267_v32 }
  0xaf   : > { %v279_v4 = vand.u32 65535, %v275_v0  ;;  %v280_v5 = vshrl.u32 %v275_v0, 16  ;;  %vm371_vm2 = vweird.f32 %v734_v23 }
  0xb0   : > { %v304_v10 = vmul.u32 %v302_v7, %v277_v2  ;;  %v305_v11 = vmul.u32 %v301_v6, %v278_v3  ;;  %v303_v15 = vmul.u32 %v301_v6, %v277_v2  ;;  %v306_v19 = vmul.u32 %v302_v7, %v278_v3 }
  0xb1   : > { %v282_v8 = vmul.u32 %v280_v5, %v277_v2  ;;  %v283_v9 = vmul.u32 %v279_v4, %v278_v3  ;;  %v281_v12 = vmul.u32 %v279_v4, %v277_v2  ;;  %v284_v14 = vmul.u32 %v280_v5, %v278_v3 }
  0xb2   : > { %v307_v16 = vshll.u32 %v304_v10, 16  ;;  %v309_v21 = vshll.u32 %v305_v11, 16  ;;  %v308_v37 = vshrl.u32 %v304_v10, 16  ;;  %v310_v43 = vshrl.u32 %v305_v11, 16 }
  0xb3   : > { %v285_v13 = vshll.u32 %v282_v8, 16  ;;  %v287_v17 = vshll.u32 %v283_v9, 16  ;;  %v286_v31 = vshrl.u32 %v282_v8, 16  ;;  %v288_v41 = vshrl.u32 %v283_v9, 16 }
  0xb4   : > { %vm311_vm6 = vc.u32 %v303_v15, %v307_v16  ;;  %v313_v22 = vadd.s32 %v307_v16, %v303_v15 }
  0xb5   : > { %vm289_vm5 = vc.u32 %v281_v12, %v285_v13  ;;  %v291_v18 = vadd.s32 %v285_v13, %v281_v12  ;;  %v312_v25 = vsel %vm311_vm6, 1, %v637_v1 }
  0xb6   : > { %v290_v20 = vsel %vm289_vm5, 1, %v637_v1  ;;  %v314_v29 = vadd.s32 %v312_v25, %v306_v19  ;;  %vm315_vm8 = vc.u32 %v313_v22, %v309_v21  ;;  %v317_v46 = vadd.s32 %v313_v22, %v309_v21 }
  0xb7   : > { %v292_v24 = vadd.s32 %v290_v20, %v284_v14  ;;  %vm293_vm7 = vc.u32 %v291_v18, %v287_v17  ;;  %v316_v36 = vsel %vm315_vm8, 1, %v637_v1 }
  0xb8   : > { %v294_v28 = vsel %vm293_vm7, 1, %v637_v1  ;;  %v318_v38 = vadd.s32 %v316_v36, %v314_v29 }
  0xb9   : > { %v296_v33 = vadd.s32 %v294_v28, %v292_v24 }
  0xba   : > { %v319_v44 = vadd.s32 %v318_v38, %v308_v37 }
  0xbb   : > { %v297_v42 = vadd.s32 %v296_v33, %v286_v31 }
  0xbc   : > { %v320_v35 = vadd.s32 %v319_v44, %v310_v43 }
  0xbd   : > { %v298_v45 = vadd.s32 %v297_v42, %v288_v41 }
  0xbe   : > { %v324_v1 = vadd.s32 1, %v320_v35 }
  0xbf   : > { %vm323_vm9 = vc.u32 %v298_v45, %v317_v46  ;;  %v322_v34 = vadd.s32 %v317_v46, %v298_v45 }
  0xc0   : > { %v325_v48 = vsel %vm323_vm9, %v324_v1, %v320_v35 }
  0xc1   : > { %v326_v49 = vadd.s32 %v325_v48, %v321_v47 }
  0xc3   : > { %v327_v50 = vadd.s32 536870912, %v326_v49 }
  0xc5   : > { %v328_v51 = vshrl.u32 %v327_v50, 30 }
  0xc7   : > { %v329_v53 = vshll.u32 %v328_v51, 30  ;;  %v352_v10 = vsub.s32 4, %v328_v51 }
  0xc9   : > { %v330_v52 = vsub.s32 %v326_v49, %v329_v53  ;;  %v353_v15 = vsel %vm230_vm12, %v352_v10, %v328_v51 }
  0xca   : > { %v355_v27 = vsel %vm792_vm13, 0, %v353_v15 }
  0xcb   : > { %vm331_vm10 = vcmp.lt.s32.totalorder %v330_v52, 0  ;;  %v332_v54 = vsub.s32 0, %v330_v52  ;;  %v372_v22 = vadd.s32 3, %v355_v27 }
  0xcd   : > { %v333_v55 = vsel %vm331_vm10, %v332_v54, %v330_v52  ;;  %v373_v29 = vand.u32 3, %v372_v22 }
  0xce   : > { %v334_v57 = vclz %v333_v55 }
  0xcf   : > { %vm375_vm14 = vcmp.eq.s32.totalorder %v373_v29, 0  ;;  %vm378_vm15 = vcmp.eq.s32.totalorder %v373_v29, 2  ;;  %vm374_vm0 = vcmp.lt.s32.totalorder %v373_v29, 2 }
  0xd0   : > { %v481_v58 = vadd.s32 4294967294, %v334_v57 }
  0xd2   : > { %vm482_vm11 = vcmp.lt.s32.totalorder %v481_v58, 0 }
  0xd3   : > { %v337_v59 = vsel %vm482_vm11, 0, %v481_v58 }
  0xd4   : > { %v338_v60 = vsub.s32 32, %v337_v59  ;;  %v342_v61 = vsub.s32 4294967266, %v337_v59  ;;  %v339_v62 = vshll.u32 %v330_v52, %v337_v59 }
  0xd6   : > { %v340_v63 = vshrl.u32 %v322_v34, %v338_v60  ;;  %v343_v0 = vadd.s32 127, %v342_v61 }
  0xd8   : > { %v341_v56 = vor.u32 %v340_v63, %v339_v62  ;;  %v344_v2 = vshll.u32 %v343_v0, 23 }
  0xda   : > { %v345_v3 = vor.u32 4788187, %v344_v2  ;;  %v348_v5 = vcvt.s32.f32 %v341_v56 }
  0xdc   : > { %v346_v4 = vand.u32 2147483647, %v345_v3 }
  0xde   : > { %v349_v6 = vmul.f32 %v348_v5, %v346_v4 }
  0xe0   : > { %v350_v7 = vxor.u32 2147483648, %v349_v6 }
  0xe2   : > { %v351_v9 = vsel %vm230_vm12, %v350_v7, %v349_v6 }
  0xe3   : > { %v354_v11 = vsel %vm792_vm13, %v734_v23, %v351_v9 }
  0xe4   : > { %v356_v12 = vmul.f32 %v354_v11, %v354_v11 }
  0xe6   : > { %v357_v13 = vmul.f32 -0.001358992, %v356_v12  ;;  %v364_v14 = vmul.f32 -0.00019511016, %v356_v12 }
  0xe8   : > { %v358_v16 = vadd.f32 0.041655596, %v357_v13  ;;  %v365_v17 = vadd.f32 0.008332121, %v364_v14 }
  0xea   : > { %v359_v18 = vmul.f32 %v358_v16, %v356_v12  ;;  %v366_v19 = vmul.f32 %v365_v17, %v356_v12 }
  0xec   : > { %v360_v20 = vadd.f32 -0.4999988, %v359_v18  ;;  %v367_v21 = vadd.f32 -0.16666654, %v366_v19 }
  0xee   : > { %v361_v24 = vmul.f32 %v360_v20, %v356_v12  ;;  %v368_v25 = vmul.f32 %v367_v21, %v356_v12 }
  0xf0   : > { %v362_v26 = vadd.f32 1.0, %v361_v24  ;;  %v369_v28 = vadd.f32 1.0, %v368_v25 }
  0xf2   : > { %v370_v30 = vmul.f32 %v369_v28, %v354_v11  ;;  %v379_v31 = vxor.u32 2147483648, %v362_v26 }
  0xf4   : > { %v376_v33 = vxor.u32 2147483648, %v370_v30  ;;  %v380_v37 = vsel %vm378_vm15, %v379_v31, %v370_v30 }
  0xf6   : > { %v377_v36 = vsel %vm375_vm14, %v362_v26, %v376_v33 }
  0xf7   : > { %v381_v38 = vsel %vm374_vm0, %v377_v36, %v380_v37 }
  0xf8   : > { %v382_v39 = vsel %vm371_vm2, nan, %v381_v38 }
  0xf9   : > { %384 = vst.msk [vmem:[%s183_s21] sm:$0xff] %vm383_vm1, %v382_v39 }
  0xfa   : > { %584 = shalt.err (!%p581_p5)
}
  0xfb   : > { %487 = dma.vmem_to_hbm [thread:$0]  (%p707_p4), %s400_s23, 128, %s402_s26, %s386_s15  }
  0xfc PF: > { %p493_p6 = scmp.ge.s32.totalorder %s635_s17, 2  ;;  %s413_s7 = sand.u32 1, %s615_s12  }
  0xfd   : > { %s414_s8 = scalar_lea.sflag [#allocation3], %s413_s7 }
  0xfe   : > { %p490_p7 = pnand %p493_p6, %p714_p8 }
 0x100   : > { %p491_p9 = pneg %p490_p7 }
 0x102   : > { %610 = dma.done.wait (%p491_p9), %s414_s8, 128  }
 0x103   : > { %612 = vsyncadd (%p491_p9), %s414_s8, 4294967168  ;;  %s16_s17 = sadd.s32 1, %s635_s17   ;;  %s854_s12 = smov %s619_s13 }
 0x104   : > { %p13_p10 = scmp.ge.s32.totalorder %s16_s17, 4   ;;  %s855_s13 = smov %s623_s14 }
 0x105   : > { %s856_s14 = smov %s720_s25  ;;  %s857_s15 = smov %s631_s16 }
 0x106   : > { %s858_s16 = smov %s860_s20  ;;  %15 = sbr.rel (!%p13_p10) target bundleno = 4 (0x4), region = 67 }
 0x10b   :  { %420 = vsyncpa [#allocation3], 1 }
 0x10c   :  { %422 = vsyncpa [#allocation3 + $0x1], 1 }

</bundles_post_ra>
